<compile_context>
chip_gen: v5e
topology: v5e:2x2
jax: 0.10.0
libtpu: 0.0.40
codegen_flags: <defaults>
</compile_context>

<pallas_src>
import jax
import jax.numpy as jnp
from jax.experimental import pallas as pl
from jax.experimental.pallas import tpu as pltpu


# --------------------------------------------------------------------------------------
# Kernel
# --------------------------------------------------------------------------------------
def gru_seq_kernel(z_ref, a_ref, h0_ref, wz_ref, wa_ref, whh_ref,
                   brz_ref, bin_ref, bhn_ref, out_ref, h_scr):
    """One timestep of a GRUCell; grid axis 1 iterates timesteps sequentially.

    z_ref   : (1, bt, Dz)   per-step z-features (bf16/f32 input, cast at MXU feed)
    a_ref   : (1, bt, Da)   per-step a-features
    h0_ref  : (bt, H)       initial hidden state (read only at t == 0)
    wz_ref  : (Dz, 3H)      W_ih^T rows for z  (bf16, VMEM-resident across t)
    wa_ref  : (Da, 3H)      W_ih^T rows for a  (bf16, VMEM-resident across t)
    whh_ref : (H,  3H)      W_hh^T             (bf16, VMEM-resident across t)
    brz_ref : (1, 2H)       b_ih[:2H] + b_hh[:2H]  (f32)
    bin_ref : (1, H)        b_ih[2H:]              (f32)
    bhn_ref : (1, H)        b_hh[2H:]              (f32)
    out_ref : (1, bt, H)    hidden state for this timestep
    h_scr   : (bt, H) f32   VMEM scratch carrying h across grid iterations
    """
    H = h_scr.shape[-1]

    @pl.when(pl.program_id(1) == 0)
    def _():
        h_scr[...] = h0_ref[...].astype(jnp.float32)

    h = h_scr[...]                              # (bt, H) f32

    wdt = wz_ref.dtype                          # bf16 weight feed to the MXU
    xz = z_ref[0].astype(wdt)                   # (bt, Dz)
    xa = a_ref[0].astype(wdt)                   # (bt, Da)
    hb = h.astype(wdt)                          # (bt, H)

    # Input projection split into (z-rows) + (a-rows) of W_ih^T; f32 accumulation.
    gi = (jnp.dot(xz, wz_ref[...], preferred_element_type=jnp.float32)
          + jnp.dot(xa, wa_ref[...], preferred_element_type=jnp.float32))   # (bt, 3H)
    gh = jnp.dot(hb, whh_ref[...], preferred_element_type=jnp.float32)       # (bt, 3H)

    # Gate ordering [r | z | n] along the 3H axis (torch.nn.GRUCell).
    rz = jax.nn.sigmoid(gi[:, :2 * H] + gh[:, :2 * H] + brz_ref[...])
    r = rz[:, :H]
    zg = rz[:, H:]
    n = jnp.tanh(gi[:, 2 * H:] + bin_ref[...] + r * (gh[:, 2 * H:] + bhn_ref[...]))

    h_new = (1.0 - zg) * n + zg * h             # f32
    h_scr[...] = h_new
    out_ref[0] = h_new.astype(out_ref.dtype)


def gru_sequence_pallas(z_seq_flat, a_seq_flat, h0,
                        wz_t, wa_t, whh_t, b_rz, b_in, b_hn,
                        *, bt=None):
    """Run a GRUCell over T steps entirely inside one pallas_call.

    z_seq_flat : (T, B, Dz)   a_seq_flat : (T, B, Da)   h0 : (B, H)
    wz_t (Dz,3H) / wa_t (Da,3H) / whh_t (H,3H) : bf16, pre-transposed, row-split
    b_rz (1,2H) / b_in (1,H) / b_hn (1,H)      : f32, pre-folded
    Returns all hidden states (T, B, H).
    """
    T, B, Dz = z_seq_flat.shape
    Da = a_seq_flat.shape[-1]
    H = h0.shape[-1]
    G = 3 * H

    if bt is None:
        bt = B                      # single batch tile (toy B=2); tile with bt%8==0 at scale
    assert B % bt == 0
    nb = B // bt

    grid = (nb, T)                  # batch tiles outer ("parallel"), time inner ("arbitrary")

    in_specs = [
        pl.BlockSpec((1, bt, Dz), lambda b, t: (t, b, 0)),   # z step tile
        pl.BlockSpec((1, bt, Da), lambda b, t: (t, b, 0)),   # a step tile
        pl.BlockSpec((bt, H),     lambda b, t: (b, 0)),      # h0 (resident per batch tile)
        pl.BlockSpec((Dz, G),     lambda b, t: (0, 0)),      # W_ih^T (z rows)  -- resident
        pl.BlockSpec((Da, G),     lambda b, t: (0, 0)),      # W_ih^T (a rows)  -- resident
        pl.BlockSpec((H, G),      lambda b, t: (0, 0)),      # W_hh^T           -- resident
        pl.BlockSpec((1, 2 * H),  lambda b, t: (0, 0)),      # folded r/z bias  -- resident
        pl.BlockSpec((1, H),      lambda b, t: (0, 0)),      # b_in             -- resident
        pl.BlockSpec((1, H),      lambda b, t: (0, 0)),      # b_hn             -- resident
    ]
    out_spec = pl.BlockSpec((1, bt, H), lambda b, t: (t, b, 0))

    return pl.pallas_call(
        gru_seq_kernel,
        out_shape=jax.ShapeDtypeStruct((T, B, H), h0.dtype),
        grid_spec=pltpu.PrefetchScalarGridSpec(
            num_scalar_prefetch=0,
            grid=grid,
            in_specs=in_specs,
            out_specs=out_spec,
            scratch_shapes=[pltpu.VMEM((bt, H), jnp.float32)],   # carried hidden state
        ),
        compiler_params=pltpu.CompilerParams(
            dimension_semantics=("parallel", "arbitrary"),
            vmem_limit_bytes=32 * 1024 * 1024,   # bf16 weights ~4.7 MB at H=512 -> ample headroom on v7x
        ),
    )(z_seq_flat, a_seq_flat, h0, wz_t, wa_t, whh_t, b_rz, b_in, b_hn)


# --------------------------------------------------------------------------------------
# Module wrappers
# --------------------------------------------------------------------------------------
class SequenceModelPallas:
    """GRUCell over flattened [z, a]; weights stored in kernel-canonical layout."""

    def __init__(self, a_cls, a_size=1, h_size=512, z_size=32, z_cls=32, key=None,
                 weight_dtype=jnp.bfloat16):
        self.a_cls, self.a_size = a_cls, a_size
        self.h_size, self.z_size, self.z_cls = h_size, z_size, z_cls
        d_z = z_size * z_cls
        d_a = a_size * a_cls
        d_in = d_z + d_a
        H = h_size

        if key is None:
            key = jax.random.PRNGKey(42)
        k1, k2, k3, k4 = jax.random.split(key, 4)
        bound = 1.0 / jnp.sqrt(h_size)
        # f32 masters in PyTorch GRUCell layout (kept for the pure-JAX reference).
        self.w_ih = jax.random.uniform(k1, (3 * H, d_in), jnp.float32, -bound, bound)
        self.w_hh = jax.random.uniform(k2, (3 * H, H), jnp.float32, -bound, bound)
        self.b_ih = jax.random.uniform(k3, (3 * H,), jnp.float32, -bound, bound)
        self.b_hh = jax.random.uniform(k4, (3 * H,), jnp.float32, -bound, bound)

        # Kernel-canonical params: pre-transposed, row-split, bf16 weights; folded biases.
        w_ih_t = self.w_ih.T                                   # (D_in, 3H)
        self.wz_t = w_ih_t[:d_z].astype(weight_dtype)          # (Dz, 3H)
        self.wa_t = w_ih_t[d_z:].astype(weight_dtype)          # (Da, 3H)
        self.whh_t = self.w_hh.T.astype(weight_dtype)          # (H, 3H)
        self.b_rz = (self.b_ih[:2 * H] + self.b_hh[:2 * H]).reshape(1, 2 * H)
        self.b_in = self.b_ih[2 * H:].reshape(1, H)
        self.b_hn = self.b_hh[2 * H:].reshape(1, H)

    def forward_sequence(self, z_seq, a_seq, h0, *, bt=None):
        """z_seq: (T,B,z_size,z_cls), a_seq: (T,B,a_size,a_cls), h0: (B,H) -> (T,B,H)."""
        T, B = z_seq.shape[:2]
        z_flat = z_seq.reshape(T, B, -1)
        a_flat = a_seq.reshape(T, B, -1)
        return gru_sequence_pallas(z_flat, a_flat, h0,
                                   self.wz_t, self.wa_t, self.whh_t,
                                   self.b_rz, self.b_in, self.b_hn, bt=bt)

    def __call__(self, z, a, h):
        """Single step (original module semantics): z (B,zs,zc), a (B,as,ac), h (B,H)."""
        out = self.forward_sequence(z[None], a[None], h)
        return out[0]


class EmbedderPreproPallas:
    """Direct analogue of the PyTorch `EmbedderPrepro` wrapper: pure composition.
    # TODO(synk): prepro/embedder are injected submodules with no fixed ops; nothing
    # to lower here beyond calling them in order — the Pallas hot path is the GRU above.
    """

    def __init__(self, embedder, prepro):
        self.embedder = embedder
        self.prepro = prepro

    def __call__(self, x):
        return self.embedder(self.prepro(x))


# --------------------------------------------------------------------------------------
# References (mirror kernel numerics: bf16 weight feed, f32 accumulation)
# --------------------------------------------------------------------------------------
def gru_step_ref_bf16(model, xz, xa, h):
    H = h.shape[-1]
    wdt = model.wz_t.dtype
    gi = (jnp.dot(xz.astype(wdt), model.wz_t, preferred_element_type=jnp.float32)
          + jnp.dot(xa.astype(wdt), model.wa_t, preferred_element_type=jnp.float32))
    gh = jnp.dot(h.astype(wdt), model.whh_t, preferred_element_type=jnp.float32)
    rz = jax.nn.sigmoid(gi[:, :2 * H] + gh[:, :2 * H] + model.b_rz)
    r, zg = rz[:, :H], rz[:, H:]
    n = jnp.tanh(gi[:, 2 * H:] + model.b_in + r * (gh[:, 2 * H:] + model.b_hn))
    return (1.0 - zg) * n + zg * h


def gru_step_ref_f32(model, x, h):
    """Full-f32 torch.nn.GRUCell semantics on the concatenated input."""
    H = h.shape[-1]
    gi = x @ model.w_ih.T + model.b_ih
    gh = h @ model.w_hh.T + model.b_hh
    r = jax.nn.sigmoid(gi[:, :H] + gh[:, :H])
    z = jax.nn.sigmoid(gi[:, H:2 * H] + gh[:, H:2 * H])
    n = jnp.tanh(gi[:, 2 * H:] + r * gh[:, 2 * H:])
    return (1.0 - z) * n + z * h


# --------------------------------------------------------------------------------------
# Test
# --------------------------------------------------------------------------------------
if __name__ == "__main__":
    # Small shapes consistent with the module's forward:
    #   z: (T, B, z_size, z_cls), a: (T, B, a_size, a_cls), h0: (B, h_size)
    T, B, a_cls, a_size, h_size, z_size, z_cls = 6, 2, 4, 1, 32, 8, 4

    key = jax.random.PRNGKey(0)
    kz, ka, kh, kp = jax.random.split(key, 4)
    z_seq = jax.random.normal(kz, (T, B, z_size, z_cls), jnp.float32)
    a_seq = jax.random.normal(ka, (T, B, a_size, a_cls), jnp.float32)
    h0 = jax.random.normal(kh, (B, h_size), jnp.float32)

    model = SequenceModelPallas(a_cls, a_size=a_size, h_size=h_size,
                                z_size=z_size, z_cls=z_cls, key=kp)

    # --- full in-kernel sequence rollout ---
    h_all = model.forward_sequence(z_seq, a_seq, h0)
    h_all = jax.block_until_ready(h_all)
    assert h_all.shape == (T, B, h_size)

    # Reference rollout (bf16 weight feed, f32 accumulation — the kernel's contract).
    h_ref = h0
    refs_bf16 = []
    refs_f32 = []
    h_ref_f32 = h0
    for t in range(T):
        xz = z_seq[t].reshape(B, -1)
        xa = a_seq[t].reshape(B, -1)
        h_ref = gru_step_ref_bf16(model, xz, xa, h_ref)
        refs_bf16.append(h_ref)
        h_ref_f32 = gru_step_ref_f32(model, jnp.concatenate([xz, xa], axis=1), h_ref_f32)
        refs_f32.append(h_ref_f32)
    refs_bf16 = jnp.stack(refs_bf16)
    refs_f32 = jnp.stack(refs_f32)

    assert jnp.allclose(h_all, refs_bf16, atol=1e-3, rtol=1e-3), \
        float(jnp.max(jnp.abs(h_all - refs_bf16)))
    # Loose check that bf16-weight numerics track the full-f32 GRUCell.
    assert jnp.allclose(h_all, refs_f32, atol=5e-2, rtol=5e-2), \
        float(jnp.max(jnp.abs(h_all - refs_f32)))

    # --- single-step path (original module's __call__ semantics) ---
    h1 = model(z_seq[0], a_seq[0], h0)
    h1 = jax.block_until_ready(h1)
    assert h1.shape == (B, h_size)
    assert jnp.allclose(h1, refs_bf16[0], atol=1e-3, rtol=1e-3)

    print("KERNEL_OK")
</pallas_src>

<mosaic_0001>
module attributes {stable_mosaic.version = 11 : i64} {
  func.func @gru_seq_kernel(%arg0: i32, %arg1: i32, %arg2: memref<1x2x32xf32, #tpu.memory_space<vmem>>, %arg3: memref<1x2x4xf32, #tpu.memory_space<vmem>>, %arg4: memref<2x32xf32, #tpu.memory_space<vmem>>, %arg5: memref<32x96xbf16, #tpu.memory_space<vmem>>, %arg6: memref<4x96xbf16, #tpu.memory_space<vmem>>, %arg7: memref<32x96xbf16, #tpu.memory_space<vmem>>, %arg8: memref<1x64xf32, #tpu.memory_space<vmem>>, %arg9: memref<1x32xf32, #tpu.memory_space<vmem>>, %arg10: memref<1x32xf32, #tpu.memory_space<vmem>>, %arg11: memref<1x2x32xf32, #tpu.memory_space<vmem>>, %arg12: memref<2x32xf32, #tpu.memory_space<vmem>>) attributes {dimension_semantics = [#tpu.dimension_semantics<parallel>, #tpu.dimension_semantics<arbitrary>], iteration_bounds = array<i64: 1, 6>, scalar_prefetch = 0 : i64, scratch_operands = 1 : i64, tpu.core_type = #tpu.core_type<tc>, window_params = [{transform_indices = @transform_0, window_bounds = array<i64: 1, 2, 32>}, {transform_indices = @transform_1, window_bounds = array<i64: 1, 2, 4>}, {transform_indices = @transform_2, window_bounds = array<i64: 2, 32>}, {pipeline_mode = #tpu.pipeline_mode<synchronous>, transform_indices = @transform_3, window_bounds = array<i64: 32, 96>}, {pipeline_mode = #tpu.pipeline_mode<synchronous>, transform_indices = @transform_4, window_bounds = array<i64: 4, 96>}, {pipeline_mode = #tpu.pipeline_mode<synchronous>, transform_indices = @transform_5, window_bounds = array<i64: 32, 96>}, {pipeline_mode = #tpu.pipeline_mode<synchronous>, transform_indices = @transform_6, window_bounds = array<i64: 1, 64>}, {pipeline_mode = #tpu.pipeline_mode<synchronous>, transform_indices = @transform_7, window_bounds = array<i64: 1, 32>}, {pipeline_mode = #tpu.pipeline_mode<synchronous>, transform_indices = @transform_8, window_bounds = array<i64: 1, 32>}, {transform_indices = @transform_9, window_bounds = array<i64: 1, 2, 32>}]} {
    %c0_i32 = arith.constant 0 : i32
    %0 = arith.cmpi eq, %arg1, %c0_i32 : i32
    %1 = arith.extui %0 : i1 to i32
    %c0_i32_0 = arith.constant 0 : i32
    %2 = arith.cmpi ne, %1, %c0_i32_0 : i32
    scf.if %2 {
      %c0_29 = arith.constant 0 : index
      %c0_30 = arith.constant 0 : index
      %51 = vector.load %arg4[%c0_29, %c0_30] : memref<2x32xf32, #tpu.memory_space<vmem>>, vector<2x32xf32>
      %c0_31 = arith.constant 0 : index
      %c0_32 = arith.constant 0 : index
      %52 = vector.load %arg12[%c0_31, %c0_32] : memref<2x32xf32, #tpu.memory_space<vmem>>, vector<2x32xf32>
      tpu.vector_store %arg12[%c0_31, %c0_32], %51 {strides = array<i32>} : memref<2x32xf32, #tpu.memory_space<vmem>>, vector<2x32xf32>,
    } else {
    }
    %c0 = arith.constant 0 : index
    %c0_1 = arith.constant 0 : index
    %3 = vector.load %arg12[%c0, %c0_1] : memref<2x32xf32, #tpu.memory_space<vmem>>, vector<2x32xf32>
    %c0_2 = arith.constant 0 : index
    %c0_3 = arith.constant 0 : index
    %c0_4 = arith.constant 0 : index
    %4 = vector.load %arg2[%c0_2, %c0_3, %c0_4] : memref<1x2x32xf32, #tpu.memory_space<vmem>>, vector<1x2x32xf32>
    %5 = vector.shape_cast %4 : vector<1x2x32xf32> to vector<2x32xf32>
    %6 = arith.truncf %5 : vector<2x32xf32> to vector<2x32xbf16>
    %c0_5 = arith.constant 0 : index
    %c0_6 = arith.constant 0 : index
    %c0_7 = arith.constant 0 : index
    %7 = vector.load %arg3[%c0_5, %c0_6, %c0_7] : memref<1x2x4xf32, #tpu.memory_space<vmem>>, vector<1x2x4xf32>
    %8 = vector.shape_cast %7 : vector<1x2x4xf32> to vector<2x4xf32>
    %9 = arith.truncf %8 : vector<2x4xf32> to vector<2x4xbf16>
    %10 = arith.truncf %3 : vector<2x32xf32> to vector<2x32xbf16>
    %c0_8 = arith.constant 0 : index
    %c0_9 = arith.constant 0 : index
    %11 = vector.load %arg5[%c0_8, %c0_9] : memref<32x96xbf16, #tpu.memory_space<vmem>>, vector<32x96xbf16>
    %cst = arith.constant dense<0.000000e+00> : vector<2x96xf32>
    %12 = tpu.matmul %6, %11, %cst {dimension_numbers = #tpu.dot_dimension_numbers<[1], [0], [0], [1], [0, 0, 1, 1], [], []>} : vector<2x32xbf16>, vector<32x96xbf16>, vector<2x96xf32> -> vector<2x96xf32>
    %c0_10 = arith.constant 0 : index
    %c0_11 = arith.constant 0 : index
    %13 = vector.load %arg6[%c0_10, %c0_11] : memref<4x96xbf16, #tpu.memory_space<vmem>>, vector<4x96xbf16>
    %cst_12 = arith.constant dense<0.000000e+00> : vector<2x96xf32>
    %14 = tpu.matmul %9, %13, %cst_12 {dimension_numbers = #tpu.dot_dimension_numbers<[1], [0], [0], [1], [0, 0, 1, 1], [], []>} : vector<2x4xbf16>, vector<4x96xbf16>, vector<2x96xf32> -> vector<2x96xf32>
    %15 = arith.addf %12, %14 : vector<2x96xf32>
    %c0_13 = arith.constant 0 : index
    %c0_14 = arith.constant 0 : index
    %16 = vector.load %arg7[%c0_13, %c0_14] : memref<32x96xbf16, #tpu.memory_space<vmem>>, vector<32x96xbf16>
    %cst_15 = arith.constant dense<0.000000e+00> : vector<2x96xf32>
    %17 = tpu.matmul %10, %16, %cst_15 {dimension_numbers = #tpu.dot_dimension_numbers<[1], [0], [0], [1], [0, 0, 1, 1], [], []>} : vector<2x32xbf16>, vector<32x96xbf16>, vector<2x96xf32> -> vector<2x96xf32>
    %18 = vector.extract_strided_slice %15 {offsets = [0, 0], sizes = [2, 64], strides = [1, 1]} : vector<2x96xf32> to vector<2x64xf32>
    %19 = vector.extract_strided_slice %17 {offsets = [0, 0], sizes = [2, 64], strides = [1, 1]} : vector<2x96xf32> to vector<2x64xf32>
    %20 = arith.addf %18, %19 : vector<2x64xf32>
    %c0_16 = arith.constant 0 : index
    %c0_17 = arith.constant 0 : index
    %21 = vector.load %arg8[%c0_16, %c0_17] : memref<1x64xf32, #tpu.memory_space<vmem>>, vector<1x64xf32>
    %22 = vector.broadcast %21 : vector<1x64xf32> to vector<2x64xf32>
    %23 = arith.addf %20, %22 : vector<2x64xf32>
    %24 = arith.negf %23 : vector<2x64xf32>
    %25 = math.exp %24 : vector<2x64xf32>
    %cst_18 = arith.constant 1.000000e+00 : f32
    %26 = vector.broadcast %cst_18 : f32 to vector<2x64xf32>
    %27 = arith.addf %26, %25 : vector<2x64xf32>
    %28 = arith.divf %26, %27 : vector<2x64xf32>
    %29 = vector.extract_strided_slice %28 {offsets = [0, 0], sizes = [2, 32], strides = [1, 1]} : vector<2x64xf32> to vector<2x32xf32>
    %30 = vector.extract_strided_slice %28 {offsets = [0, 32], sizes = [2, 32], strides = [1, 1]} : vector<2x64xf32> to vector<2x32xf32>
    %31 = vector.extract_strided_slice %15 {offsets = [0, 64], sizes = [2, 32], strides = [1, 1]} : vector<2x96xf32> to vector<2x32xf32>
    %c0_19 = arith.constant 0 : index
    %c0_20 = arith.constant 0 : index
    %32 = vector.load %arg9[%c0_19, %c0_20] : memref<1x32xf32, #tpu.memory_space<vmem>>, vector<1x32xf32>
    %33 = vector.broadcast %32 : vector<1x32xf32> to vector<2x32xf32>
    %34 = arith.addf %31, %33 : vector<2x32xf32>
    %35 = vector.extract_strided_slice %17 {offsets = [0, 64], sizes = [2, 32], strides = [1, 1]} : vector<2x96xf32> to vector<2x32xf32>
    %c0_21 = arith.constant 0 : index
    %c0_22 = arith.constant 0 : index
    %36 = vector.load %arg10[%c0_21, %c0_22] : memref<1x32xf32, #tpu.memory_space<vmem>>, vector<1x32xf32>
    %37 = vector.broadcast %36 : vector<1x32xf32> to vector<2x32xf32>
    %38 = arith.addf %35, %37 : vector<2x32xf32>
    %39 = arith.mulf %29, %38 : vector<2x32xf32>
    %40 = arith.addf %34, %39 : vector<2x32xf32>
    %41 = math.tanh %40 : vector<2x32xf32>
    %cst_23 = arith.constant 1.000000e+00 : f32
    %42 = vector.broadcast %cst_23 : f32 to vector<2x32xf32>
    %43 = arith.subf %42, %30 : vector<2x32xf32>
    %44 = arith.mulf %43, %41 : vector<2x32xf32>
    %45 = arith.mulf %30, %3 : vector<2x32xf32>
    %46 = arith.addf %44, %45 : vector<2x32xf32>
    %c0_24 = arith.constant 0 : index
    %c0_25 = arith.constant 0 : index
    %47 = vector.load %arg12[%c0_24, %c0_25] : memref<2x32xf32, #tpu.memory_space<vmem>>, vector<2x32xf32>
    tpu.vector_store %arg12[%c0_24, %c0_25], %46 {strides = array<i32>} : memref<2x32xf32, #tpu.memory_space<vmem>>, vector<2x32xf32>,
    %c0_26 = arith.constant 0 : index
    %c0_27 = arith.constant 0 : index
    %c0_28 = arith.constant 0 : index
    %48 = vector.load %arg11[%c0_26, %c0_27, %c0_28] : memref<1x2x32xf32, #tpu.memory_space<vmem>>, vector<1x2x32xf32>
    %49 = vector.shape_cast %48 : vector<1x2x32xf32> to vector<2x32xf32>
    %50 = vector.shape_cast %46 : vector<2x32xf32> to vector<1x2x32xf32>
    tpu.vector_store %arg11[%c0_26, %c0_27, %c0_28], %50 {strides = array<i32>} : memref<1x2x32xf32, #tpu.memory_space<vmem>>, vector<1x2x32xf32>,
    return
  }
  func.func @transform_0(%arg0: i32, %arg1: i32) -> (i32, i32, i32) {
    %c0_i32 = arith.constant 0 : i32
    %c0_i32_0 = arith.constant 0 : i32
    return %arg1, %arg0, %c0_i32 : i32, i32, i32
  }
  func.func @transform_1(%arg0: i32, %arg1: i32) -> (i32, i32, i32) {
    %c0_i32 = arith.constant 0 : i32
    %c0_i32_0 = arith.constant 0 : i32
    return %arg1, %arg0, %c0_i32 : i32, i32, i32
  }
  func.func @transform_2(%arg0: i32, %arg1: i32) -> (i32, i32) {
    %c0_i32 = arith.constant 0 : i32
    %c0_i32_0 = arith.constant 0 : i32
    return %arg0, %c0_i32 : i32, i32
  }
  func.func @transform_3(%arg0: i32, %arg1: i32) -> (i32, i32) {
    %c0_i32 = arith.constant 0 : i32
    %c0_i32_0 = arith.constant 0 : i32
    %c0_i32_1 = arith.constant 0 : i32
    return %c0_i32, %c0_i32_0 : i32, i32
  }
  func.func @transform_4(%arg0: i32, %arg1: i32) -> (i32, i32) {
    %c0_i32 = arith.constant 0 : i32
    %c0_i32_0 = arith.constant 0 : i32
    %c0_i32_1 = arith.constant 0 : i32
    return %c0_i32, %c0_i32_0 : i32, i32
  }
  func.func @transform_5(%arg0: i32, %arg1: i32) -> (i32, i32) {
    %c0_i32 = arith.constant 0 : i32
    %c0_i32_0 = arith.constant 0 : i32
    %c0_i32_1 = arith.constant 0 : i32
    return %c0_i32, %c0_i32_0 : i32, i32
  }
  func.func @transform_6(%arg0: i32, %arg1: i32) -> (i32, i32) {
    %c0_i32 = arith.constant 0 : i32
    %c0_i32_0 = arith.constant 0 : i32
    %c0_i32_1 = arith.constant 0 : i32
    return %c0_i32, %c0_i32_0 : i32, i32
  }
  func.func @transform_7(%arg0: i32, %arg1: i32) -> (i32, i32) {
    %c0_i32 = arith.constant 0 : i32
    %c0_i32_0 = arith.constant 0 : i32
    %c0_i32_1 = arith.constant 0 : i32
    return %c0_i32, %c0_i32_0 : i32, i32
  }
  func.func @transform_8(%arg0: i32, %arg1: i32) -> (i32, i32) {
    %c0_i32 = arith.constant 0 : i32
    %c0_i32_0 = arith.constant 0 : i32
    %c0_i32_1 = arith.constant 0 : i32
    return %c0_i32, %c0_i32_0 : i32, i32
  }
  func.func @transform_9(%arg0: i32, %arg1: i32) -> (i32, i32, i32) {
    %c0_i32 = arith.constant 0 : i32
    %c0_i32_0 = arith.constant 0 : i32
    return %arg1, %arg0, %c0_i32 : i32, i32, i32
  }
}

</mosaic_0001>

<bundles_post_ra>
// kernel: tpu_custom_call.1
= control target key start
LH: loop header
LB: loop body
LE: loop exit
PB: predicated region body
PF: predicated region fallthrough
CT: control target
= control target key end

     0   :  { %s1250_s0 = inlined_call_operand.hbm [shape: f32[6,2,32], index: 0, kind: input, shape index: {}]   ;;  %s1251_s1 = inlined_call_operand.vmem [shape: f32[6,2,4], index: 1, kind: input, shape index: {}]   ;;  %s1252_s2 = inlined_call_operand.vmem [shape: f32[2,32], index: 2, kind: input, shape index: {}]   ;;  %s1253_s3 = inlined_call_operand.vmem [shape: bf16[32,96], index: 3, kind: input, shape index: {}]   ;;  %s1254_s4 = inlined_call_operand.vmem [shape: bf16[4,96], index: 4, kind: input, shape index: {}]   ;;  %s1255_s5 = inlined_call_operand.hbm [shape: bf16[32,96], index: 5, kind: input, shape index: {}]   ;;  %s1256_s6 = inlined_call_operand.vmem [shape: f32[1,64], index: 6, kind: input, shape index: {}]   ;;  %s1257_s7 = inlined_call_operand.vmem [shape: f32[1,32], index: 7, kind: input, shape index: {}]   ;;  %s1258_s8 = inlined_call_operand.vmem [shape: f32[1,32], index: 8, kind: input, shape index: {}]   ;;  %s1259_s9 = inlined_call_operand.hbm [shape: f32[6,2,32], index: 9, kind: output, shape index: {}]  }
   0x1   :  { %1262 = sst [smem:[#allocation15_spill]] %s1255_s5 }
   0x2   :  { %14 = vsyncpa [#allocation4], 0 }
   0x3   :  { %16 = vsyncpa [#allocation4 + $0x1], 0 }
   0x4   :  { %17 = vsyncpa [#allocation7], 0 }
   0x5   :  { %18 = vsyncpa [#allocation5], 0 }
   0x6   :  { %20 = vsyncpa [#allocation5 + $0x1], 0  ;;  %s1069_s30 = smov 0   ;;  %s1071_s10 = smov 0  }
   0x7   :  { %s1073_s11 = smov 0   ;;  %s1075_s12 = smov 0  }
   0x8   :  { %s1077_s13 = smov 0   ;;  %s1079_s14 = smov 0  }
   0x9 LB: > { %1263 = sst [smem:[#allocation12_spill]] %s991_s30  ;;  %s736_s15 = sadd.s32 4294967295, %s1011_s14   ;;  %s1011_s14 = sphi %s1079_s14, %s26_s14   ;;  %s1007_s13 = sphi %s1077_s13, %s1280_s13   ;;  %s1003_s12 = sphi %s1075_s12, %s1279_s12   ;;  %s999_s11 = sphi %s1073_s11, %s1278_s11   ;;  %s995_s10 = sphi %s1071_s10, %s1277_s10   ;;  %s991_s30 = sphi %s1069_s30, %s1276_s30  }
   0xa   : > { %p738_p0 = scmp.ge.s32.totalorder %s1011_s14, 1  ;;  %p1101_p1 = scmp.eq.s32.totalorder %s736_s15, 0 }
   0xb   : > { %p279_p2 = scmp.lt.s32.totalorder %s1011_s14, 7  ;;  %s1265_s5 = sld [smem:[#allocation15_spill]] }
   0xc   : > { %s1013_s21 = smov [#allocation6]   ;;  %s1014_s23 = smov 64  }
   0xd   : > { %p1109_p3 = pnand %p738_p0, %p279_p2  ;;  %s305_s22 = sshll.u32 %s1013_s21, 4  ;;  %s306_s22 = int_to_ptr.vmem [resolvable:$true] %s305_s22 }
   0xe   : > { %s1015_s24 = smov 4   ;;  %s737_s25 = sadd.s32 4294967294, %s1011_s14  }
   0xf   : > { %p786_p4 = pneg %p1109_p3  ;;  %s35_s26 = sadd.s32 1, %s1007_s13 }
  0x10   : > { %s47_s27 = sadd.s32 1, %s999_s11  ;;  %p36_p6 = scmp.ge.s32.totalorder %s35_s26, 6 }
  0x11   : > { %s303_s19 = sshll.u32 %s1265_s5, 4  ;;  %p787_p5 = pnand %p786_p4, %p1101_p1  ;;  %s304_s19 = int_to_ptr.hbm [resolvable:$true] %s303_s19 }
  0x12   : > { %p54_p7 = scmp.ne.s32.totalorder %s999_s11, %s995_s10  ;;  %p55_p8 = scmp.eq.s32.totalorder %s1011_s14, 0 }
  0x13   : > { %789 = dma.hbm_to_vmem [thread:$0]  (!%p787_p5), %s304_s19, 256, %s306_s22, [#allocation7], %s1014_s23, %s1014_s23, %s1015_s24  }
  0x14   : > { %p60_p9 = scmp.ne.s32.totalorder %s995_s10, %s991_s30  ;;  %s1282_s26 = smov (%p36_p6, %s35_s26), 0 }
  0x15   : > { %1267 = sst [smem:[#allocation13_spill]] %s1282_s26  ;;  %p1127_p10 = por %p55_p8, %p54_p7 }
  0x16   : > { %p1133_p11 = por %p1101_p1, %p60_p9  ;;  %s42_s17 = ssub.s32 %s1007_s13, %s1282_s26 }
  0x17   : > { %p266_p12 = scmp.eq.s32.totalorder %s736_s15, 5  ;;  %p45_p13 = scmp.eq.s32.totalorder %s42_s17, 0 }
  0x18   : > { %p272_p0 = scmp.eq.s32.totalorder %s737_s25, 5  ;;  %p799_p4 = scmp.lt.s32.totalorder %s1011_s14, 6 }
  0x19   : > { %p1139_p2 = por %p266_p12, %p54_p7  ;;  %s328_s22 = sand.u32 1, %s999_s11  }
  0x1a   : > { %s1145_s19 = scalar_select %p45_p13, %s999_s11, %s47_s27  }
  0x1b   : > { %p1147_p5 = por %p272_p0, %p60_p9  ;;  %s742_s23 = sshll.u32 %s328_s22, 1 }
  0x1c   : > { %1271 = sst [smem:[#allocation14_spill]] %s1145_s19  ;;  %s743_s24 = sshll.u32 %s1007_s13, 1 }
  0x1d   : > { %s337_s15 = scalar_lea.hbm %s1250_s0, %s743_s24  ;;  %s332_s17 = scalar_lea.vmem [#allocation3], %s742_s23 }
  0x1e   : > { %s341_s25 = sshll.u32 %s332_s17, 4  ;;  %s339_s30 = sshll.u32 %s337_s15, 4  ;;  %s342_s25 = int_to_ptr.vmem [resolvable:$true] %s341_s25  ;;  %s340_s30 = int_to_ptr.hbm [resolvable:$true] %s339_s30 }
  0x1f   : > { %p791_p6 = pnand %p799_p4, %p1127_p10  ;;  %s329_s27 = scalar_lea.sflag [#allocation4], %s328_s22 }
  0x20   : > { %360 = sbr.rel (%p1109_p3) target bundleno = 656 (0x290), region = 56  ;;  %s1161_s19 = sand.u32 (!%p1109_p3), 1, %s995_s10  }
  0x21   : > { %793 = dma.hbm_to_vmem [thread:$0]  (!%p791_p6), %s340_s30, 32, %s342_s25, %s329_s27  }
  0x22   : > { %s745_s5 = sshll.u32 (!%p1109_p3), %s1161_s19, 1  ;;  %s363_s26 = scalar_lea.sflag (!%p1109_p3), [#allocation4], %s1161_s19 }
  0x23   : > { %s366_s23 = scalar_lea.vmem (!%p1109_p3), [#allocation3], %s745_s5 }
  0x25   : > { %978 = dma.done.wait (%p1133_p11), %s363_s26, 32  }
  0x26   : > { %980 = vsyncadd (%p1133_p11), %s363_s26, 4294967264 }
  0x27   : > { %982 = dma.done.wait (%p1101_p1), [#allocation7], 256  }
  0x28   : > { %984 = vsyncadd (%p1101_p1), [#allocation7], 4294967040  ;;  %p418_p3 = scmp.lt.s32.totalorder %s1003_s12, 5  ;;  %s1178_s15 = scalar_lea.vmem [#allocation8], %s745_s5 }
  0x29   : > { %p749_p7 = scmp.ne.s32.totalorder %s1003_s12, 0 }
  0x2a   : > { %s419_s30 = scalar_select %p418_p3, %s1003_s12, 5 }
  0x2b   : > { %433 = sbr.rel (%p749_p7) target bundleno = 50 (0x32), region = 68 }
  0x2c   : > { %s748_s20 = sshll.u32 %s419_s30, 1 }
  0x2d   : > { %s424_s24 = scalar_lea.vmem %s1251_s1, %s748_s20 }
  0x30   : > { %v434_v0 = vld [vmem:[%s1252_s2] sm:$0x3]  ;;  %vm435_vm0 = vcmask 254976  }
  0x31   : > { %436 = vst.msk [vmem:[#allocation2] sm:$0x3] %vm435_vm0, %v434_v0 }
  0x32 PF: > { %v777_v1 = vld [vmem:[#allocation6 + $0x8] sm:$0xff]  ;;  %v776_v3 = vld [vmem:[#allocation6] sm:$0xff]  ;;  %vm452_vm1 = vcmask 1041408   ;;  %v447_v5 = vld [vmem:[%s1254_s4] sm:$0x3]  ;;  %vm448_vm2 = vcmask 31744  }
  0x33   : > { %v775_v2 = vld [vmem:[%s1253_s3 + $0x8] sm:$0xff]  ;;  %v774_v6 = vld [vmem:[%s1253_s3] sm:$0xff]  ;;  %523 = vmatpush.bf16.msra.mxu2 %v777_v1  ;;  %v454_v7 = vsel %vm452_vm1, %v447_v5, 0  ;;  %s1016_s17 = smov 64   ;;  %vm481_vm3 = vcmask 261120   ;;  %s1017_s16 = smov 96  }
  0x34   : > { %491 = vmatpush.bf16.msra.mxu1 %v775_v2  ;;  %v440_v8 = vld [vmem:[%s424_s24] sm:$0x3]  ;;  %v438_v9 = vld [vmem:[%s366_s23] sm:$0x3]  ;;  %463 = vmatpush.bf16.msra.mxu0 %v454_v7  ;;  %s1018_s25 = smov 32   ;;  %s771_s27 = sshll.u32 %s1003_s12, 1 }
  0x35   : > { %v441_v10 = vpack.c.bf16 %v440_v8, %v440_v8  ;;  %v856_v11 = vld [vmem:[%s1258_s8] ss:$0 sm:$0xff]  ;;  %v439_v14 = vpack.c.bf16 %v438_v9, %v438_v9  ;;  %s611_s30 = scalar_lea.hbm %s1259_s9, %s771_s27  ;;  %s613_s20 = sshll.u32 %s1178_s15, 4  ;;  %vm596_vm8 = vcmask 254976   ;;  %s614_s20 = int_to_ptr.vmem [resolvable:$true] %s613_s20 }
  0x36   : > { %v857_v12 = vld [vmem:[%s1257_s7] ss:$0 sm:$0xff]  ;;  %565 = vrot.lane.b32.xlu0 %v856_v11, %s1016_s17  ;;  %s615_s28 = sshll.u32 %s611_s30, 4  ;;  %s600_s22 = scalar_lea.sflag [#allocation5], %s1161_s19  ;;  %s616_s28 = int_to_ptr.hbm [resolvable:$true] %s615_s28 }
  0x37   : > { %524 = vmatpush.bf16.msra.mxu2 %v776_v3  ;;  %750 = vmatmul.msk.bf16.vlgmr.msra.gmra.mxu0 %vm448_vm2, %v441_v10  ;;  %v858_v25 = vld [vmem:[%s1256_s6] ss:$0 sm:$0xff]  ;;  %s939_s29 = sshra.s32 %s616_s28, 4  ;;  %s945_s24 = scalar_lea.hbm %s1259_s9, 12  ;;  %s940_s29 = int_to_ptr.hbm [resolvable:$true] %s939_s29 }
  0x38   : > { %v1187_v4 = vld [vmem:[#allocation2] sm:$0x3]  ;;  %492 = vmatpush.bf16.msra.mxu1 %v774_v6  ;;  %558 = vrot.lane.b32.xlu1 %v857_v12, %s1016_s17  ;;  %p946_p10 = scmp.lt.s32.totalorder %s940_s29, %s1259_s9 }
  0x39   : > { %v442_v13 = vpack.c.bf16 %v1187_v4, %v1187_v4 }
  0x3b   : > { %768 = vmatmul.msk.bf16.vlgmr.msra.gmra.mxu2 %vm481_vm3, %v442_v13  ;;  %759 = vmatmul.msk.bf16.vlgmr.msra.gmra.mxu1 %vm481_vm3, %v439_v14 }
  0xa8   : > { %v566_v18 = vpop.permute.xlu0 %565 }
  0xaa   : > { %v559_v42 = vpop.permute.xlu1 %558 }
  0xb4   : > { %v465_v15 = vpop.f32.mrf.mxu0 }
  0xb8   : > { %v494_v16 = vpop.f32.mrf.mxu1 }
  0xb9   : > { %v495_v17 = vadd.f32 %v494_v16, %v465_v15 }
  0xbb   : > { %v561_v43 = vadd.f32 %v559_v42, %v495_v17 }
  0xbc   : > { %v467_v20 = vpop.f32.mrf.mxu0 }
  0xbe   : > { %v526_v19 = vpop.f32.mrf.mxu2 }
  0xbf   : > { %v530_v21 = vadd.f32 %v526_v19, %v495_v17  ;;  %v568_v22 = vadd.f32 %v566_v18, %v526_v19 }
  0xc0   : > { %v496_v23 = vpop.f32.mrf.mxu1 }
  0xc1   : > { %570 = vrot.lane.b32.xlu0 %v568_v22, %s1016_s17  ;;  %v535_v26 = vadd.f32 %v858_v25, %v530_v21 }
  0xc3   : > { %v769_v27 = vmul.f32 -1.442695, %v535_v26 }
  0xc5   : > { %859 = vpow2.f32 %v769_v27 }
  0xc6   : > { %v528_v24 = vpop.f32.mrf.mxu2 }
  0xcb   : > { %v860_v28 = vpop.eup %859 }
  0xcc   : > { %v539_v29 = vadd.f32 1.0, %v860_v28 }
  0xce   : > { %861 = vrcp.f32 %v539_v29  ;;  %v551_v35 = vand.u32 2147483648, %v539_v29  ;;  %vm545_vm5 = vweird.f32 %v539_v29  ;;  %v549_v36 = vand.u32 2147483647, %v539_v29 }
  0xd0   : > { %v552_v38 = vor.u32 1.1754944e-38, %v551_v35  ;;  %vm550_vm7 = vcmp.eq.f32.partialorder %v549_v36, 8.507059e+37 }
  0xd4   : > { %v862_v30 = vpop.eup %861 }
  0xd5   : > { %v541_v31 = vmul.f32 %v862_v30, %v539_v29  ;;  %vm546_vm4 = vweird.f32 %v862_v30 }
  0xd6   : > { %vm547_vm6 = vmor %vm545_vm5, %vm546_vm4 }
  0xd7   : > { %v542_v32 = vsub.f32 1.0, %v541_v31 }
  0xd9   : > { %v543_v33 = vmul.f32 %v862_v30, %v542_v32 }
  0xdb   : > { %v544_v34 = vadd.f32 %v862_v30, %v543_v33 }
  0xdd   : > { %v548_v37 = vsel %vm547_vm6, %v862_v30, %v544_v34 }
  0xde   : > { %v553_v40 = vsel %vm550_vm7, %v552_v38, %v548_v37 }
  0xdf   : > { %v580_v48 = vsub.f32 1.0, %v553_v40 }
 0x133   : > { %v571_v39 = vpop.permute.xlu0 %570 }
 0x134   : > { %v573_v41 = vmul.f32 %v571_v39, %v553_v40 }
 0x136   : > { %575 = vrot.lane.b32.xlu1 %v573_v41, %s1016_s17  ;;  %s941_s17 = scalar_lea.hbm %s940_s29, 2 }
 0x137   : > { %p942_p1 = scmp.ne.s32.totalorder %s940_s29, %s941_s17  ;;  %p947_p11 = scmp.lt.s32.totalorder %s945_s24, %s941_s17 }
 0x139   : > { %p943_p8 = pnand %p942_p1, %p1139_p2  ;;  %p948_p12 = por %p947_p11, %p946_p10 }
 0x13b   : > { %p944_p9 = pneg %p943_p8 }
 0x13d   : > { %p949_p13 = pnand %p948_p12, %p944_p9 }
 0x1a8   : > { %v576_v44 = vpop.permute.xlu1 %575 }
 0x1a9   : > { %v578_v45 = vadd.f32 %v576_v44, %v561_v43 }
 0x1ab   : > { %863 = vtanh.f32 %v578_v45 }
 0x1b1   : > { %v864_v46 = vpop.eup %863 }
 0x1b2   : > { %582 = vrot.lane.b32.xlu2 %v864_v46, %s1017_s16 }
 0x1ba   : > { %587 = vrot.lane.b32.xlu2 %v1187_v4, %s1018_s25 }
 0x20c   : > { %v583_v47 = vpop.permute.xlu2 %582 }
 0x20d   : > { %v585_v50 = vmul.f32 %v583_v47, %v580_v48 }
 0x214   : > { %v588_v49 = vpop.permute.xlu2 %587 }
 0x215   : > { %v590_v51 = vmul.f32 %v588_v49, %v553_v40 }
 0x217   : > { %v591_v52 = vadd.f32 %v590_v51, %v585_v50 }
 0x219   : > { %593 = vrot.lane.b32.xlu0 %v591_v52, %s1017_s16 }
 0x28b   : > { %v594_v53 = vpop.permute.xlu0 %593 }
 0x28c   : > { %597 = vst.msk [vmem:[#allocation2] sm:$0x3] %vm596_vm8, %v594_v53 }
 0x28d   : > { %598 = vst.msk [vmem:[%s1178_s15] sm:$0x3] %vm596_vm8, %v594_v53 }
 0x28e   : > { %952 = shalt.err (!%p949_p13)
}
 0x28f   : > { %784 = dma.vmem_to_hbm [thread:$0]  (%p1139_p2), %s614_s20, 32, %s616_s28, %s600_s22  }
 0x290 PF: > { %s1273_s19 = sld [smem:[#allocation12_spill]]  ;;  %p801_p0 = scmp.ge.s32.totalorder %s1011_s14, 2 }
 0x292   : > { %p795_p4 = pnand %p801_p0, %p1147_p5 }
 0x294   : > { %p796_p6 = pneg %p795_p4 }
 0x296   : > { %s627_s15 = sand.u32 1, %s1273_s19  }
 0x297   : > { %s628_s27 = scalar_lea.sflag [#allocation5], %s627_s15 }
 0x298   : > { %986 = dma.done.wait (%p796_p6), %s628_s27, 32  }
 0x299   : > { %988 = vsyncadd (%p796_p6), %s628_s27, 4294967264  ;;  %s26_s14 = sadd.s32 1, %s1011_s14   ;;  %s1274_s5 = sld [smem:[#allocation14_spill]] }
 0x29a   : > { %p23_p3 = scmp.ge.s32.totalorder %s26_s14, 8   ;;  %s1275_s18 = sld [smem:[#allocation13_spill]] }
 0x29b   : > { %s1276_s30 = smov %s995_s10  ;;  %s1277_s10 = smov %s999_s11 }
 0x29c   : > { %s1279_s12 = smov %s1007_s13  ;;  %25 = sbr.rel (!%p23_p3) target bundleno = 9 (0x9), region = 115 }
 0x29f   : > { %s1278_s11 = smov %s1274_s5 }
 0x2a0   : > { %s1280_s13 = smov %s1275_s18 }
 0x2a1   :  { %634 = vsyncpa [#allocation4], 1 }
 0x2a2   :  { %636 = vsyncpa [#allocation4 + $0x1], 1 }
 0x2a3   :  { %637 = vsyncpa [#allocation7], 1 }
 0x2a4   :  { %638 = vsyncpa [#allocation5], 1 }
 0x2a5   :  { %640 = vsyncpa [#allocation5 + $0x1], 1 }

</bundles_post_ra>
